<compile_context>
chip_gen: v6e
topology: v6e:2x2x1
jax: 0.10.0
libtpu: 0.0.40
codegen_flags: <defaults>
</compile_context>

<pallas_src>
import jax
import jax.numpy as jnp
from jax.experimental import pallas as pl
from jax.experimental.pallas import tpu as pltpu


def _round_up(x, m):
    return (x + m - 1) // m * m


def _cdiv(a, b):
    return (a + b - 1) // b


def _critic_kernel(x_ref, w1_ref, b1_ref, w2_ref, b2_ref, w3_ref, b3_ref,
                   o_ref):
    # Per grid step:
    #   x:(TB,Din)  w1:(Din,H)  b1:(1,H)  w2:(H,H)  b2:(1,H)
    #   w3:(1,H)    b3:(1,1)    o:(TB,1)
    cdt = w1_ref.dtype  # MXU operand dtype (bf16 default); accumulation is f32.

    x = x_ref[...].astype(cdt)

    # Layer 1 + ReLU (bias/ReLU on the f32 accumulator).
    h1 = jnp.dot(x, w1_ref[...], preferred_element_type=jnp.float32)
    h1 = jnp.maximum(h1 + b1_ref[...], 0.0)

    # Layer 2 + ReLU.
    h2 = jnp.dot(h1.astype(cdt), w2_ref[...],
                 preferred_element_type=jnp.float32)
    h2 = jnp.maximum(h2 + b2_ref[...], 0.0)

    # Layer 3 (out_features = 1): VPU multiply + lane reduce, not an MXU matmul.
    w3 = w3_ref[...].astype(jnp.float32)                         # (1, H)
    q = jnp.sum(h2 * w3, axis=-1, keepdims=True) + b3_ref[...]   # (TB, 1)
    o_ref[...] = q.astype(o_ref.dtype)


def _select_batch_tiling(batch, tile_b):
    """Pick (tile, padded_batch, n_steps).

    Large tiles amortize the ~0.35us/step pipeline overhead; >=2 steps when
    B > 8 keep both v7x TensorCores busy under dimension_semantics="parallel";
    tile = round_up(cdiv(B, n_steps), 8) keeps padding to < 8 rows per step.
    """
    tile_b = max(8, _round_up(int(tile_b), 8))
    n_steps = max(1, _cdiv(batch, tile_b))
    if batch > 8:
        n_steps = max(n_steps, 2)
    tb = _round_up(_cdiv(batch, n_steps), 8)
    return tb, tb * n_steps, n_steps


def critic_forward(state, action, params, *, tile_b=2048):
    """Fused critic: concat(state, action) -> 256 -> ReLU -> 256 -> ReLU -> 1."""
    w1, b1, w2, b2, w3_row, b3 = params
    batch, state_dim = state.shape
    action_dim = action.shape[1]
    in_dim = state_dim + action_dim
    hidden = w2.shape[0]
    assert w1.shape == (in_dim, hidden)

    tb, b_pad, n_steps = _select_batch_tiling(batch, tile_b)

    # Wrapper-side concat (tiny copy) + minimal zero padding of dead rows.
    x = jnp.concatenate([state, action], axis=-1)
    if b_pad != batch:
        x = jnp.pad(x, ((0, b_pad - batch), (0, 0)))

    flops = 2 * b_pad * (in_dim * hidden + hidden * hidden + hidden)
    bytes_accessed = int(
        sum(int(a.size) * a.dtype.itemsize
            for a in (w1, b1, w2, b2, w3_row, b3))
        + b_pad * in_dim * x.dtype.itemsize   # activations in
        + b_pad * 4)                          # q out

    const = lambda i: (0, 0)  # weights/biases: VMEM-resident across steps

    def build(single_buffer_consts):
        if single_buffer_consts:
            # Grid-invariant operands never re-fetch; single-buffer them to
            # free VMEM headroom.
            wspec = lambda shape: pl.BlockSpec(shape, const,
                                               pipeline_mode=pl.Buffered(1))
        else:
            wspec = lambda shape: pl.BlockSpec(shape, const)
        return pl.pallas_call(
            _critic_kernel,
            out_shape=jax.ShapeDtypeStruct((b_pad, 1), jnp.float32),
            grid=(n_steps,),
            in_specs=[
                pl.BlockSpec((tb, in_dim), lambda i: (i, 0)),   # x tile
                wspec((in_dim, hidden)),                        # w1
                wspec((1, hidden)),                             # b1
                wspec((hidden, hidden)),                        # w2
                wspec((1, hidden)),                             # b2
                wspec((1, hidden)),                             # w3 row
                wspec((1, 1)),                                  # b3
            ],
            out_specs=pl.BlockSpec((tb, 1), lambda i: (i, 0)),
            compiler_params=pltpu.CompilerParams(
                dimension_semantics=("parallel",),
                # v5e scoped-VMEM default is 16 MiB; raise for large tiles.
                vmem_limit_bytes=(32 * 1024 * 1024 if tb >= 1024 else None)),
            cost_estimate=pl.CostEstimate(
                flops=flops, transcendentals=0,
                bytes_accessed=bytes_accessed),
        )

    args = (x, w1, b1, w2, b2, w3_row, b3)
    try:
        out = build(True)(*args)
    except Exception:
        # pl.Buffered(1) is a pure VMEM optimization; fall back to default
        # double-buffering if this JAX build rejects buffer_count=1.
        out = build(False)(*args)

    return out[:batch]


def init_critic_params(key, state_dim, action_dim, hidden=256,
                       mxu_dtype=jnp.bfloat16):
    """Mirror torch.nn.Linear default init (U[-1/sqrt(fan_in), 1/sqrt(fan_in)]).

    MXU matmul weights (w1, w2) are stored in `mxu_dtype` (bf16 default);
    biases, the (1, hidden) w3 row and b3 stay f32 so all elementwise work
    runs on the f32 accumulator path.
    """
    in_dim = state_dim + action_dim

    def linear(k, fan_in, fan_out):
        kw, kb = jax.random.split(k)
        bound = 1.0 / jnp.sqrt(jnp.float32(fan_in))
        # stored as [in, out] so the kernel computes x @ W
        w = jax.random.uniform(kw, (fan_in, fan_out), jnp.float32, -bound, bound)
        b = jax.random.uniform(kb, (1, fan_out), jnp.float32, -bound, bound)
        return w, b

    k1, k2, k3 = jax.random.split(key, 3)
    w1, b1 = linear(k1, in_dim, hidden)
    w2, b2 = linear(k2, hidden, hidden)
    w3, b3 = linear(k3, hidden, 1)
    w3_row = w3.T                 # (1, hidden) row for the in-kernel VPU reduce
    b3 = b3.reshape(1, 1)
    return (w1.astype(mxu_dtype), b1, w2.astype(mxu_dtype), b2, w3_row, b3)


def cast_mxu_weights(params, dtype):
    """Cast only the MXU matmul weights (w1, w2); everything else stays f32."""
    w1, b1, w2, b2, w3_row, b3 = params
    return (w1.astype(dtype), b1, w2.astype(dtype), b2, w3_row, b3)


if __name__ == "__main__":
    key = jax.random.PRNGKey(0)
    k_state, k_action, k_params, k_s2, k_a2 = jax.random.split(key, 5)

    batch, state_dim, action_dim = 8, 16, 8
    state = jax.random.normal(k_state, (batch, state_dim), jnp.float32)
    action = jax.random.normal(k_action, (batch, action_dim), jnp.float32)

    # f32 reference params (and an exactness check of the fused kernel math).
    params_f32 = init_critic_params(k_params, state_dim, action_dim,
                                    mxu_dtype=jnp.float32)
    w1, b1, w2, b2, w3_row, b3 = params_f32
    hi = jax.lax.Precision.HIGHEST

    def ref_fwd(s, a):
        h = jnp.concatenate([s, a], axis=-1)
        h = jnp.maximum(jnp.dot(h, w1, precision=hi) + b1, 0.0)
        h = jnp.maximum(jnp.dot(h, w2, precision=hi) + b2, 0.0)
        return jnp.dot(h, w3_row.T, precision=hi) + b3

    q_ref = ref_fwd(state, action)

    # f32 weight path.
    q = jax.block_until_ready(critic_forward(state, action, params_f32))
    assert q.shape == (batch, 1)
    assert jnp.allclose(q, q_ref, atol=2e-4, rtol=2e-4)

    # Default bf16 MXU-weight path (f32 accumulate) — looser tolerance.
    params_bf16 = cast_mxu_weights(params_f32, jnp.bfloat16)
    q_bf16 = jax.block_until_ready(critic_forward(state, action, params_bf16))
    assert q_bf16.shape == (batch, 1)
    assert jnp.allclose(q_bf16, q_ref, atol=5e-2, rtol=5e-2)

    # Ragged batch: exercises minimal padding + a multi-step parallel grid.
    b2_ = 10
    s2 = jax.random.normal(k_s2, (b2_, state_dim), jnp.float32)
    a2 = jax.random.normal(k_a2, (b2_, action_dim), jnp.float32)
    q2 = jax.block_until_ready(critic_forward(s2, a2, params_f32, tile_b=8))
    assert q2.shape == (b2_, 1)
    assert jnp.allclose(q2, ref_fwd(s2, a2), atol=2e-4, rtol=2e-4)

    print("KERNEL_OK")
</pallas_src>

<mosaic_0001>
module attributes {stable_mosaic.version = 11 : i64} {
  func.func @_critic_kernel(%arg0: i32, %arg1: memref<8x24xf32, #tpu.memory_space<vmem>>, %arg2: memref<24x256xf32, #tpu.memory_space<vmem>>, %arg3: memref<1x256xf32, #tpu.memory_space<vmem>>, %arg4: memref<256x256xf32, #tpu.memory_space<vmem>>, %arg5: memref<1x256xf32, #tpu.memory_space<vmem>>, %arg6: memref<1x256xf32, #tpu.memory_space<vmem>>, %arg7: memref<1x1xf32, #tpu.memory_space<vmem>>, %arg8: memref<8x1xf32, #tpu.memory_space<vmem>>) attributes {dimension_semantics = [#tpu.dimension_semantics<parallel>], iteration_bounds = array<i64: 1>, scalar_prefetch = 0 : i64, scratch_operands = 0 : i64, tpu.core_type = #tpu.core_type<tc>, window_params = [{transform_indices = @transform_0, window_bounds = array<i64: 8, 24>}, {pipeline_mode = #tpu.pipeline_mode<synchronous>, transform_indices = @transform_1, window_bounds = array<i64: 24, 256>}, {pipeline_mode = #tpu.pipeline_mode<synchronous>, transform_indices = @transform_2, window_bounds = array<i64: 1, 256>}, {pipeline_mode = #tpu.pipeline_mode<synchronous>, transform_indices = @transform_3, window_bounds = array<i64: 256, 256>}, {pipeline_mode = #tpu.pipeline_mode<synchronous>, transform_indices = @transform_4, window_bounds = array<i64: 1, 256>}, {pipeline_mode = #tpu.pipeline_mode<synchronous>, transform_indices = @transform_5, window_bounds = array<i64: 1, 256>}, {pipeline_mode = #tpu.pipeline_mode<synchronous>, transform_indices = @transform_6, window_bounds = array<i64: 1, 1>}, {transform_indices = @transform_7, window_bounds = array<i64: 8, 1>}]} {
    %c0 = arith.constant 0 : index
    %c0_0 = arith.constant 0 : index
    %0 = vector.load %arg1[%c0, %c0_0] : memref<8x24xf32, #tpu.memory_space<vmem>>, vector<8x24xf32>
    %c0_1 = arith.constant 0 : index
    %c0_2 = arith.constant 0 : index
    %1 = vector.load %arg2[%c0_1, %c0_2] : memref<24x256xf32, #tpu.memory_space<vmem>>, vector<24x256xf32>
    %cst = arith.constant dense<0.000000e+00> : vector<8x256xf32>
    %2 = tpu.matmul %0, %1, %cst {dimension_numbers = #tpu.dot_dimension_numbers<[1], [0], [0], [1], [0, 0, 1, 1], [], []>} : vector<8x24xf32>, vector<24x256xf32>, vector<8x256xf32> -> vector<8x256xf32>
    %c0_3 = arith.constant 0 : index
    %c0_4 = arith.constant 0 : index
    %3 = vector.load %arg3[%c0_3, %c0_4] : memref<1x256xf32, #tpu.memory_space<vmem>>, vector<1x256xf32>
    %4 = vector.broadcast %3 : vector<1x256xf32> to vector<8x256xf32>
    %5 = arith.addf %2, %4 : vector<8x256xf32>
    %cst_5 = arith.constant 0.000000e+00 : f32
    %6 = vector.broadcast %cst_5 : f32 to vector<8x256xf32>
    %7 = arith.maximumf %5, %6 : vector<8x256xf32>
    %c0_6 = arith.constant 0 : index
    %c0_7 = arith.constant 0 : index
    %8 = vector.load %arg4[%c0_6, %c0_7] : memref<256x256xf32, #tpu.memory_space<vmem>>, vector<256x256xf32>
    %cst_8 = arith.constant dense<0.000000e+00> : vector<8x256xf32>
    %9 = tpu.matmul %7, %8, %cst_8 {dimension_numbers = #tpu.dot_dimension_numbers<[1], [0], [0], [1], [0, 0, 1, 1], [], []>} : vector<8x256xf32>, vector<256x256xf32>, vector<8x256xf32> -> vector<8x256xf32>
    %c0_9 = arith.constant 0 : index
    %c0_10 = arith.constant 0 : index
    %10 = vector.load %arg5[%c0_9, %c0_10] : memref<1x256xf32, #tpu.memory_space<vmem>>, vector<1x256xf32>
    %11 = vector.broadcast %10 : vector<1x256xf32> to vector<8x256xf32>
    %12 = arith.addf %9, %11 : vector<8x256xf32>
    %cst_11 = arith.constant 0.000000e+00 : f32
    %13 = vector.broadcast %cst_11 : f32 to vector<8x256xf32>
    %14 = arith.maximumf %12, %13 : vector<8x256xf32>
    %c0_12 = arith.constant 0 : index
    %c0_13 = arith.constant 0 : index
    %15 = vector.load %arg6[%c0_12, %c0_13] : memref<1x256xf32, #tpu.memory_space<vmem>>, vector<1x256xf32>
    %16 = vector.broadcast %15 : vector<1x256xf32> to vector<8x256xf32>
    %17 = arith.mulf %14, %16 : vector<8x256xf32>
    %cst_14 = arith.constant dense<0.000000e+00> : vector<8xf32>
    %18 = vector.multi_reduction <add>, %17, %cst_14 [1] : vector<8x256xf32> to vector<8xf32>
    %19 = vector.shape_cast %18 : vector<8xf32> to vector<8x1xf32>
    %c0_15 = arith.constant 0 : index
    %c0_16 = arith.constant 0 : index
    %20 = vector.load %arg7[%c0_15, %c0_16] : memref<1x1xf32, #tpu.memory_space<vmem>>, vector<1x1xf32>
    %21 = vector.broadcast %20 : vector<1x1xf32> to vector<8x1xf32>
    %22 = arith.addf %19, %21 : vector<8x1xf32>
    %c0_17 = arith.constant 0 : index
    %c0_18 = arith.constant 0 : index
    %23 = vector.load %arg8[%c0_17, %c0_18] : memref<8x1xf32, #tpu.memory_space<vmem>>, vector<8x1xf32>
    tpu.vector_store %arg8[%c0_17, %c0_18], %22 {strides = array<i32>} : memref<8x1xf32, #tpu.memory_space<vmem>>, vector<8x1xf32>,
    return
  }
  func.func @transform_0(%arg0: i32) -> (i32, i32) {
    %c0_i32 = arith.constant 0 : i32
    %c0_i32_0 = arith.constant 0 : i32
    return %arg0, %c0_i32 : i32, i32
  }
  func.func @transform_1(%arg0: i32) -> (i32, i32) {
    %c0_i32 = arith.constant 0 : i32
    %c0_i32_0 = arith.constant 0 : i32
    %c0_i32_1 = arith.constant 0 : i32
    return %c0_i32, %c0_i32_0 : i32, i32
  }
  func.func @transform_2(%arg0: i32) -> (i32, i32) {
    %c0_i32 = arith.constant 0 : i32
    %c0_i32_0 = arith.constant 0 : i32
    %c0_i32_1 = arith.constant 0 : i32
    return %c0_i32, %c0_i32_0 : i32, i32
  }
  func.func @transform_3(%arg0: i32) -> (i32, i32) {
    %c0_i32 = arith.constant 0 : i32
    %c0_i32_0 = arith.constant 0 : i32
    %c0_i32_1 = arith.constant 0 : i32
    return %c0_i32, %c0_i32_0 : i32, i32
  }
  func.func @transform_4(%arg0: i32) -> (i32, i32) {
    %c0_i32 = arith.constant 0 : i32
    %c0_i32_0 = arith.constant 0 : i32
    %c0_i32_1 = arith.constant 0 : i32
    return %c0_i32, %c0_i32_0 : i32, i32
  }
  func.func @transform_5(%arg0: i32) -> (i32, i32) {
    %c0_i32 = arith.constant 0 : i32
    %c0_i32_0 = arith.constant 0 : i32
    %c0_i32_1 = arith.constant 0 : i32
    return %c0_i32, %c0_i32_0 : i32, i32
  }
  func.func @transform_6(%arg0: i32) -> (i32, i32) {
    %c0_i32 = arith.constant 0 : i32
    %c0_i32_0 = arith.constant 0 : i32
    %c0_i32_1 = arith.constant 0 : i32
    return %c0_i32, %c0_i32_0 : i32, i32
  }
  func.func @transform_7(%arg0: i32) -> (i32, i32) {
    %c0_i32 = arith.constant 0 : i32
    %c0_i32_0 = arith.constant 0 : i32
    return %arg0, %c0_i32 : i32, i32
  }
}

module attributes {stable_mosaic.version = 11 : i64} {
  func.func @_critic_kernel(%arg0: i32, %arg1: memref<8x24xf32, #tpu.memory_space<vmem>>, %arg2: memref<24x256xf32, #tpu.memory_space<vmem>>, %arg3: memref<1x256xf32, #tpu.memory_space<vmem>>, %arg4: memref<256x256xf32, #tpu.memory_space<vmem>>, %arg5: memref<1x256xf32, #tpu.memory_space<vmem>>, %arg6: memref<1x256xf32, #tpu.memory_space<vmem>>, %arg7: memref<1x1xf32, #tpu.memory_space<vmem>>, %arg8: memref<8x1xf32, #tpu.memory_space<vmem>>) attributes {dimension_semantics = [#tpu.dimension_semantics<parallel>], iteration_bounds = array<i64: 1>, scalar_prefetch = 0 : i64, scratch_operands = 0 : i64, tpu.core_type = #tpu.core_type<tc>, window_params = [{transform_indices = @transform_0, window_bounds = array<i64: 8, 24>}, {pipeline_mode = #tpu.pipeline_mode<synchronous>, transform_indices = @transform_1, window_bounds = array<i64: 24, 256>}, {pipeline_mode = #tpu.pipeline_mode<synchronous>, transform_indices = @transform_2, window_bounds = array<i64: 1, 256>}, {pipeline_mode = #tpu.pipeline_mode<synchronous>, transform_indices = @transform_3, window_bounds = array<i64: 256, 256>}, {pipeline_mode = #tpu.pipeline_mode<synchronous>, transform_indices = @transform_4, window_bounds = array<i64: 1, 256>}, {pipeline_mode = #tpu.pipeline_mode<synchronous>, transform_indices = @transform_5, window_bounds = array<i64: 1, 256>}, {pipeline_mode = #tpu.pipeline_mode<synchronous>, transform_indices = @transform_6, window_bounds = array<i64: 1, 1>}, {transform_indices = @transform_7, window_bounds = array<i64: 8, 1>}]} {
    %c0 = arith.constant 0 : index
    %c0_0 = arith.constant 0 : index
    %0 = vector.load %arg1[%c0, %c0_0] : memref<8x24xf32, #tpu.memory_space<vmem>>, vector<8x24xf32>
    %c0_1 = arith.constant 0 : index
    %c0_2 = arith.constant 0 : index
    %1 = vector.load %arg2[%c0_1, %c0_2] : memref<24x256xf32, #tpu.memory_space<vmem>>, vector<24x256xf32>
    %cst = arith.constant dense<0.000000e+00> : vector<8x256xf32>
    %2 = tpu.matmul %0, %1, %cst {dimension_numbers = #tpu.dot_dimension_numbers<[1], [0], [0], [1], [0, 0, 1, 1], [], []>} : vector<8x24xf32>, vector<24x256xf32>, vector<8x256xf32> -> vector<8x256xf32>
    %c0_3 = arith.constant 0 : index
    %c0_4 = arith.constant 0 : index
    %3 = vector.load %arg3[%c0_3, %c0_4] : memref<1x256xf32, #tpu.memory_space<vmem>>, vector<1x256xf32>
    %4 = vector.broadcast %3 : vector<1x256xf32> to vector<8x256xf32>
    %5 = arith.addf %2, %4 : vector<8x256xf32>
    %cst_5 = arith.constant 0.000000e+00 : f32
    %6 = vector.broadcast %cst_5 : f32 to vector<8x256xf32>
    %7 = arith.maximumf %5, %6 : vector<8x256xf32>
    %c0_6 = arith.constant 0 : index
    %c0_7 = arith.constant 0 : index
    %8 = vector.load %arg4[%c0_6, %c0_7] : memref<256x256xf32, #tpu.memory_space<vmem>>, vector<256x256xf32>
    %cst_8 = arith.constant dense<0.000000e+00> : vector<8x256xf32>
    %9 = tpu.matmul %7, %8, %cst_8 {dimension_numbers = #tpu.dot_dimension_numbers<[1], [0], [0], [1], [0, 0, 1, 1], [], []>} : vector<8x256xf32>, vector<256x256xf32>, vector<8x256xf32> -> vector<8x256xf32>
    %c0_9 = arith.constant 0 : index
    %c0_10 = arith.constant 0 : index
    %10 = vector.load %arg5[%c0_9, %c0_10] : memref<1x256xf32, #tpu.memory_space<vmem>>, vector<1x256xf32>
    %11 = vector.broadcast %10 : vector<1x256xf32> to vector<8x256xf32>
    %12 = arith.addf %9, %11 : vector<8x256xf32>
    %cst_11 = arith.constant 0.000000e+00 : f32
    %13 = vector.broadcast %cst_11 : f32 to vector<8x256xf32>
    %14 = arith.maximumf %12, %13 : vector<8x256xf32>
    %c0_12 = arith.constant 0 : index
    %c0_13 = arith.constant 0 : index
    %15 = vector.load %arg6[%c0_12, %c0_13] : memref<1x256xf32, #tpu.memory_space<vmem>>, vector<1x256xf32>
    %16 = vector.broadcast %15 : vector<1x256xf32> to vector<8x256xf32>
    %17 = arith.mulf %14, %16 : vector<8x256xf32>
    %cst_14 = arith.constant dense<0.000000e+00> : vector<8xf32>
    %18 = vector.multi_reduction <add>, %17, %cst_14 [1] : vector<8x256xf32> to vector<8xf32>
    %19 = vector.shape_cast %18 : vector<8xf32> to vector<8x1xf32>
    %c0_15 = arith.constant 0 : index
    %c0_16 = arith.constant 0 : index
    %20 = vector.load %arg7[%c0_15, %c0_16] : memref<1x1xf32, #tpu.memory_space<vmem>>, vector<1x1xf32>
    %21 = vector.broadcast %20 : vector<1x1xf32> to vector<8x1xf32>
    %22 = arith.addf %19, %21 : vector<8x1xf32>
    %c0_17 = arith.constant 0 : index
    %c0_18 = arith.constant 0 : index
    %23 = vector.load %arg8[%c0_17, %c0_18] : memref<8x1xf32, #tpu.memory_space<vmem>>, vector<8x1xf32>
    tpu.vector_store %arg8[%c0_17, %c0_18], %22 {strides = array<i32>} : memref<8x1xf32, #tpu.memory_space<vmem>>, vector<8x1xf32>,
    return
  }
  func.func @transform_0(%arg0: i32) -> (i32, i32) {
    %c0_i32 = arith.constant 0 : i32
    %c0_i32_0 = arith.constant 0 : i32
    return %arg0, %c0_i32 : i32, i32
  }
  func.func @transform_1(%arg0: i32) -> (i32, i32) {
    %c0_i32 = arith.constant 0 : i32
    %c0_i32_0 = arith.constant 0 : i32
    %c0_i32_1 = arith.constant 0 : i32
    return %c0_i32, %c0_i32_0 : i32, i32
  }
  func.func @transform_2(%arg0: i32) -> (i32, i32) {
    %c0_i32 = arith.constant 0 : i32
    %c0_i32_0 = arith.constant 0 : i32
    %c0_i32_1 = arith.constant 0 : i32
    return %c0_i32, %c0_i32_0 : i32, i32
  }
  func.func @transform_3(%arg0: i32) -> (i32, i32) {
    %c0_i32 = arith.constant 0 : i32
    %c0_i32_0 = arith.constant 0 : i32
    %c0_i32_1 = arith.constant 0 : i32
    return %c0_i32, %c0_i32_0 : i32, i32
  }
  func.func @transform_4(%arg0: i32) -> (i32, i32) {
    %c0_i32 = arith.constant 0 : i32
    %c0_i32_0 = arith.constant 0 : i32
    %c0_i32_1 = arith.constant 0 : i32
    return %c0_i32, %c0_i32_0 : i32, i32
  }
  func.func @transform_5(%arg0: i32) -> (i32, i32) {
    %c0_i32 = arith.constant 0 : i32
    %c0_i32_0 = arith.constant 0 : i32
    %c0_i32_1 = arith.constant 0 : i32
    return %c0_i32, %c0_i32_0 : i32, i32
  }
  func.func @transform_6(%arg0: i32) -> (i32, i32) {
    %c0_i32 = arith.constant 0 : i32
    %c0_i32_0 = arith.constant 0 : i32
    %c0_i32_1 = arith.constant 0 : i32
    return %c0_i32, %c0_i32_0 : i32, i32
  }
  func.func @transform_7(%arg0: i32) -> (i32, i32) {
    %c0_i32 = arith.constant 0 : i32
    %c0_i32_0 = arith.constant 0 : i32
    return %arg0, %c0_i32 : i32, i32
  }
}

</mosaic_0001>

<bundles_post_ra>
// kernel: tpu_custom_call.1
= control target key start
LH: loop header
LB: loop body
LE: loop exit
PB: predicated region body
PF: predicated region fallthrough
CT: control target
= control target key end

     0   :  { %s487_s0 = inlined_call_operand.hbm [shape: f32[8,24], index: 0, kind: input, shape index: {}]   ;;  %s488_s1 = inlined_call_operand.hbm [shape: f32[24,256], index: 1, kind: input, shape index: {}]   ;;  %s489_s2 = inlined_call_operand.vmem [shape: f32[1,256], index: 2, kind: input, shape index: {}]   ;;  %s490_s3 = inlined_call_operand.hbm [shape: f32[256,256], index: 3, kind: input, shape index: {}]   ;;  %s491_s4 = inlined_call_operand.vmem [shape: f32[1,256], index: 4, kind: input, shape index: {}]   ;;  %s492_s5 = inlined_call_operand.vmem [shape: f32[1,256], index: 5, kind: input, shape index: {}]   ;;  %s493_s6 = inlined_call_operand.<no memory space> [shape: f32[1,1], index: 6, kind: input, shape index: {}]   ;;  %s494_s7 = inlined_call_operand.vmem [shape: f32[8,1], index: 7, kind: output, shape index: {}]  }
   0x1   :  { %v12_v0 = vstv %s493_s6 }
   0x2   :  { %13 = vst [vmem:[#allocation2] sm:$0x1] %v12_v0 }
   0x3   :  { %14 = vsyncpa [#allocation4], 0 }
   0x4   :  { %15 = vsyncpa [#allocation6], 0  ;;  %s417_s26 = smov [#allocation5]  }
   0x5   :  { %s31_s27 = sshll.u32 %s417_s26, 4  ;;  %s32_s27 = int_to_ptr.vmem [resolvable:$true] %s31_s27 }
   0x6   :  { %s361_s28 = scalar_lea.vmem %s32_s27, 768  ;;  %p366_p1 = scmp.lt.s32.totalorder %s32_s27, %s32_s27 }
   0x7   :  { %p362_p0 = scmp.ne.s32.totalorder %s32_s27, %s361_s28  ;;  %p367_p2 = scmp.lt.s32.totalorder %s361_s28, %s361_s28 }
   0x9   :  { %p368_p3 = por %p367_p2, %p366_p1 }
   0xb   :  { %p369_p4 = pnand %p368_p3, %p362_p0 }
   0xd   :  { %372 = shalt.err (!%p369_p4)
}
   0xe   :  { %s418_s29 = smov 256   ;;  %s419_s30 = smov 16  }
   0xf   :  { %37 = dma.hbm_to_vmem [thread:$0]  %s488_s1, 768, %s32_s27, [#allocation6], %s418_s29, %s418_s29, %s419_s30  }
  0x10   :  { %s420_s6 = smov [#allocation3]   ;;  %s421_s11 = smov [#allocation7]  }
  0x11   :  { %s22_s10 = sshll.u32 %s420_s6, 4  ;;  %s45_s12 = sshll.u32 %s421_s11, 4  ;;  %s23_s10 = int_to_ptr.vmem [resolvable:$true] %s22_s10  ;;  %s46_s12 = int_to_ptr.vmem [resolvable:$true] %s45_s12 }
  0x12   :  { %s381_s13 = scalar_lea.vmem %s23_s10, 128  ;;  %p386_p6 = scmp.lt.s32.totalorder %s23_s10, %s23_s10 }
  0x13   :  { %p382_p5 = scmp.ne.s32.totalorder %s23_s10, %s381_s13  ;;  %p387_p7 = scmp.lt.s32.totalorder %s381_s13, %s381_s13 }
  0x15   :  { %p388_p8 = por %p387_p7, %p386_p6 }
  0x17   :  { %p389_p9 = pnand %p388_p8, %p382_p5 }
  0x19   :  { %392 = shalt.err (!%p389_p9)
}
  0x1a   :  { %25 = dma.hbm_to_vmem [thread:$0]  %s487_s0, 128, %s23_s10, [#allocation4]  }
  0x1b   :  { %s401_s16 = scalar_lea.vmem %s46_s12, 8192  ;;  %p406_p11 = scmp.lt.s32.totalorder %s46_s12, %s46_s12 }
  0x1c   :  { %p402_p10 = scmp.ne.s32.totalorder %s46_s12, %s401_s16  ;;  %p407_p12 = scmp.lt.s32.totalorder %s401_s16, %s401_s16 }
  0x1e   :  { %p408_p13 = por %p407_p12, %p406_p11 }
  0x20   :  { %p409_p0 = pnand %p408_p13, %p402_p10 }
  0x22   :  { %412 = shalt.err (!%p409_p0)
}
  0x23   :  { %51 = dma.hbm_to_vmem [thread:$0]  %s490_s3, 8192, %s46_s12, [#allocation6], %s418_s29, %s418_s29, %s419_s30  }
  0x24   :  { %413 = dma.done.wait [#allocation4], 128  }
  0x25   :  { %414 = vsyncadd [#allocation4], 4294967168 }
  0x26   :  { %415 = dma.done.wait [#allocation6], 8960  }
  0x27   :  { %416 = vsyncadd [#allocation6], 4294958336  ;;  %v422_v1 = vmov 0.0   ;;  %v73_v2 = vld [vmem:[#allocation5 + $0x28] sm:$0xff]  ;;  %v72_v3 = vld [vmem:[#allocation5 + $0x20] sm:$0xff]  ;;  %vm86_vm0 = vcmask 195584  }
  0x28   :  { %154 = vmatprep.mubr.f32.mxu0 %v422_v1  ;;  %v71_v4 = vld [vmem:[#allocation5 + $0x18] sm:$0xff]  ;;  %116 = vmatprep.subr.mxu0 %v73_v2  ;;  %v70_v5 = vld [vmem:[#allocation5 + $0x10] sm:$0xff]  ;;  %v69_v6 = vld [vmem:[#allocation5 + $0x8] sm:$0xff]  ;;  %vm337_vm1 = vcmask 7168  }
  0x29   :  { %117 = vmatpush1.msra.mxu0 %v72_v3  ;;  %v194_v7 = vld [vmem:[#allocation7 + $0xf8] sm:$0xff]  ;;  %v193_v8 = vld [vmem:[#allocation7 + $0xf0] sm:$0xff]  ;;  %v192_v10 = vld [vmem:[#allocation7 + $0xe8] sm:$0xff] }
  0x2a   :  { %118 = vmatprep.subr.mxu0 %v71_v4  ;;  %v68_v9 = vld [vmem:[#allocation5] sm:$0xff]  ;;  %239 = vmatprep.subr.mxu1 %v194_v7  ;;  %v191_v11 = vld [vmem:[#allocation7 + $0xe0] sm:$0xff]  ;;  %v67_v12 = vld [vmem:[#allocation3] sm:$0xff] }
  0x2b   :  { %119 = vmatpush1.msra.mxu0 %v70_v5  ;;  %240 = vmatpush1.msra.mxu1 %v193_v8  ;;  %v190_v13 = vld [vmem:[#allocation7 + $0xd8] sm:$0xff]  ;;  %v189_v14 = vld [vmem:[#allocation7 + $0xd0] sm:$0xff]  ;;  %v188_v15 = vld [vmem:[#allocation7 + $0xc8] sm:$0xff] }
  0x2c   :  { %120 = vmatprep.subr.mxu0 %v69_v6  ;;  %241 = vmatprep.subr.mxu1 %v192_v10  ;;  %v187_v16 = vld [vmem:[#allocation7 + $0xc0] sm:$0xff]  ;;  %v186_v17 = vld [vmem:[#allocation7 + $0xb8] sm:$0xff]  ;;  %v185_v18 = vld [vmem:[#allocation7 + $0xb0] sm:$0xff] }
  0x2d   :  { %121 = vmatpush1.msra.mxu0 %v68_v9  ;;  %242 = vmatpush1.msra.mxu1 %v191_v11  ;;  %v184_v19 = vld [vmem:[#allocation7 + $0xa8] sm:$0xff]  ;;  %v183_v20 = vld [vmem:[#allocation7 + $0xa0] sm:$0xff]  ;;  %v182_v21 = vld [vmem:[#allocation7 + $0x98] sm:$0xff]  ;;  %v76_v9 = vlaneseq }
  0x2e   :  { %345 = vmatmul.mubr.msk.f32.vlgmr.msra.gmra.mxu0 %vm86_vm0, %v67_v12  ;;  %243 = vmatprep.subr.mxu1 %v190_v13  ;;  %v181_v22 = vld [vmem:[#allocation7 + $0x90] sm:$0xff]  ;;  %v180_v23 = vld [vmem:[#allocation7 + $0x88] sm:$0xff]  ;;  %v179_v24 = vld [vmem:[#allocation7 + $0x80] sm:$0xff] }
  0x2f   :  { %244 = vmatpush1.msra.mxu1 %v189_v14  ;;  %v178_v25 = vld [vmem:[#allocation7 + $0x78] sm:$0xff]  ;;  %v177_v26 = vld [vmem:[#allocation7 + $0x70] sm:$0xff]  ;;  %v176_v27 = vld [vmem:[#allocation7 + $0x68] sm:$0xff]  ;;  %v77_v10 = vshrl.u32 %v76_v9, 7 }
  0x30   :  { %245 = vmatprep.subr.mxu1 %v188_v15  ;;  %v175_v28 = vld [vmem:[#allocation7 + $0x60] sm:$0xff]  ;;  %v174_v29 = vld [vmem:[#allocation7 + $0x58] sm:$0xff]  ;;  %v173_v30 = vld [vmem:[#allocation7 + $0x50] sm:$0xff] }
  0x31   :  { %246 = vmatpush1.msra.mxu1 %v187_v16  ;;  %v172_v31 = vld [vmem:[#allocation7 + $0x48] sm:$0xff]  ;;  %v171_v32 = vld [vmem:[#allocation7 + $0x40] sm:$0xff]  ;;  %v170_v33 = vld [vmem:[#allocation7 + $0x38] sm:$0xff]  ;;  %v78_v11 = vsub.s32 0, %v77_v10  ;;  %v82_v13 = vsub.s32 1, %v77_v10 }
  0x32   :  { %247 = vmatprep.subr.mxu1 %v186_v17  ;;  %v169_v34 = vld [vmem:[#allocation7 + $0x30] sm:$0xff]  ;;  %v168_v35 = vld [vmem:[#allocation7 + $0x28] sm:$0xff]  ;;  %v167_v36 = vld [vmem:[#allocation7 + $0x20] sm:$0xff] }
  0x33   :  { %248 = vmatpush1.msra.mxu1 %v185_v18  ;;  %v166_v37 = vld [vmem:[#allocation7 + $0x18] sm:$0xff]  ;;  %v165_v38 = vld [vmem:[#allocation7 + $0x10] sm:$0xff]  ;;  %v164_v39 = vld [vmem:[#allocation7 + $0x8] sm:$0xff] }
  0x34   :  { %249 = vmatprep.subr.mxu1 %v184_v19  ;;  %v163_v40 = vld [vmem:[#allocation7] sm:$0xff]  ;;  %v226_v41 = vld [vmem:[#allocation7 + $0x1f8] sm:$0xff]  ;;  %v225_v42 = vld [vmem:[#allocation7 + $0x1f0] sm:$0xff] }
  0x35   :  { %250 = vmatpush1.msra.mxu1 %v183_v20  ;;  %v224_v43 = vld [vmem:[#allocation7 + $0x1e8] sm:$0xff]  ;;  %v223_v44 = vld [vmem:[#allocation7 + $0x1e0] sm:$0xff]  ;;  %v222_v45 = vld [vmem:[#allocation7 + $0x1d8] sm:$0xff] }
  0x36   :  { %251 = vmatprep.subr.mxu1 %v182_v21  ;;  %v221_v46 = vld [vmem:[#allocation7 + $0x1d0] sm:$0xff]  ;;  %v220_v47 = vld [vmem:[#allocation7 + $0x1c8] sm:$0xff]  ;;  %v219_v48 = vld [vmem:[#allocation7 + $0x1c0] sm:$0xff] }
  0x37   :  { %252 = vmatpush1.msra.mxu1 %v181_v22  ;;  %v218_v49 = vld [vmem:[#allocation7 + $0x1b8] sm:$0xff]  ;;  %v217_v50 = vld [vmem:[#allocation7 + $0x1b0] sm:$0xff]  ;;  %v216_v51 = vld [vmem:[#allocation7 + $0x1a8] sm:$0xff] }
  0x38   :  { %253 = vmatprep.subr.mxu1 %v180_v23  ;;  %v215_v52 = vld [vmem:[#allocation7 + $0x1a0] sm:$0xff]  ;;  %v214_v53 = vld [vmem:[#allocation7 + $0x198] sm:$0xff]  ;;  %v213_v54 = vld [vmem:[#allocation7 + $0x190] sm:$0xff] }
  0x39   :  { %254 = vmatpush1.msra.mxu1 %v179_v24  ;;  %v212_v55 = vld [vmem:[#allocation7 + $0x188] sm:$0xff]  ;;  %v211_v56 = vld [vmem:[#allocation7 + $0x180] sm:$0xff]  ;;  %v210_v57 = vld [vmem:[#allocation7 + $0x178] sm:$0xff] }
  0x3a   :  { %255 = vmatprep.subr.mxu1 %v178_v25  ;;  %v209_v58 = vld [vmem:[#allocation7 + $0x170] sm:$0xff]  ;;  %v208_v59 = vld [vmem:[#allocation7 + $0x168] sm:$0xff]  ;;  %v207_v60 = vld [vmem:[#allocation7 + $0x160] sm:$0xff] }
  0x3b   :  { %256 = vmatpush1.msra.mxu1 %v177_v26  ;;  %v206_v61 = vld [vmem:[#allocation7 + $0x158] sm:$0xff]  ;;  %v205_v62 = vld [vmem:[#allocation7 + $0x150] sm:$0xff]  ;;  %v204_v63 = vld [vmem:[#allocation7 + $0x148] sm:$0xff] }
  0x3c   :  { %257 = vmatprep.subr.mxu1 %v176_v27  ;;  %v203_v0 = vld [vmem:[#allocation7 + $0x140] sm:$0xff]  ;;  %v202_v1 = vld [vmem:[#allocation7 + $0x138] sm:$0xff]  ;;  %v201_v2 = vld [vmem:[#allocation7 + $0x130] sm:$0xff] }
  0x3d   :  { %258 = vmatpush1.msra.mxu1 %v175_v28  ;;  %v200_v3 = vld [vmem:[#allocation7 + $0x128] sm:$0xff]  ;;  %v199_v4 = vld [vmem:[#allocation7 + $0x120] sm:$0xff]  ;;  %v198_v5 = vld [vmem:[#allocation7 + $0x118] sm:$0xff] }
  0x3e   :  { %259 = vmatprep.subr.mxu1 %v174_v29  ;;  %v197_v6 = vld [vmem:[#allocation7 + $0x110] sm:$0xff]  ;;  %v196_v7 = vld [vmem:[#allocation7 + $0x108] sm:$0xff]  ;;  %v195_v8 = vld [vmem:[#allocation7 + $0x100] sm:$0xff] }
  0x3f   :  { %260 = vmatpush1.msra.mxu1 %v173_v30  ;;  %v74_v12 = vld [vmem:[%s489_s2] sm:$0x3] }
  0x40   :  { %261 = vmatprep.subr.mxu1 %v172_v31  ;;  %v79_v14 = vrot.slane %v74_v12, %v78_v11  ;;  %v83_v15 = vrot.slane %v74_v12, %v82_v13  ;;  %v227_v22 = vld [vmem:[%s491_s4] sm:$0x3] }
  0x41   :  { %262 = vmatpush1.msra.mxu1 %v171_v32  ;;  %v232_v23 = vrot.slane %v227_v22, %v78_v11  ;;  %v236_v24 = vrot.slane %v227_v22, %v82_v13  ;;  %v312_v26 = vld [vmem:[%s492_s5] sm:$0x3] }
  0x42   :  { %263 = vmatprep.subr.mxu1 %v170_v33  ;;  %v317_v31 = vrot.slane %v312_v26, %v78_v11  ;;  %v321_v32 = vrot.slane %v312_v26, %v82_v13 }
  0x43   :  { %264 = vmatpush1.msra.mxu1 %v169_v34 }
  0x44   :  { %265 = vmatprep.subr.mxu1 %v168_v35 }
  0x45   :  { %266 = vmatpush1.msra.mxu1 %v167_v36 }
  0x46   :  { %267 = vmatprep.subr.mxu1 %v166_v37  ;;  %v346_v37 = vld [vmem:[#allocation2] ss:$0 sm:$0xff] }
  0x47   :  { %268 = vmatpush1.msra.mxu1 %v165_v38 }
  0x48   :  { %269 = vmatprep.subr.mxu1 %v164_v39 }
  0x49   :  { %270 = vmatpush1.msra.mxu1 %v163_v40 }
  0x4a   :  { %271 = vmatprep.subr.mxu1 %v226_v41 }
  0x4b   :  { %272 = vmatpush2.msra.mxu1 %v225_v42 }
  0x4c   :  { %273 = vmatprep.subr.mxu1 %v224_v43 }
  0x4d   :  { %274 = vmatpush2.msra.mxu1 %v223_v44 }
  0x4e   :  { %275 = vmatprep.subr.mxu1 %v222_v45 }
  0x4f   :  { %276 = vmatpush2.msra.mxu1 %v221_v46 }
  0x50   :  { %277 = vmatprep.subr.mxu1 %v220_v47 }
  0x51   :  { %278 = vmatpush2.msra.mxu1 %v219_v48 }
  0x52   :  { %279 = vmatprep.subr.mxu1 %v218_v49 }
  0x53   :  { %280 = vmatpush2.msra.mxu1 %v217_v50 }
  0x54   :  { %281 = vmatprep.subr.mxu1 %v216_v51 }
  0x55   :  { %282 = vmatpush2.msra.mxu1 %v215_v52 }
  0x56   :  { %283 = vmatprep.subr.mxu1 %v214_v53 }
  0x57   :  { %284 = vmatpush2.msra.mxu1 %v213_v54 }
  0x58   :  { %285 = vmatprep.subr.mxu1 %v212_v55 }
  0x59   :  { %286 = vmatpush2.msra.mxu1 %v211_v56 }
  0x5a   :  { %287 = vmatprep.subr.mxu1 %v210_v57 }
  0x5b   :  { %288 = vmatpush2.msra.mxu1 %v209_v58 }
  0x5c   :  { %289 = vmatprep.subr.mxu1 %v208_v59 }
  0x5d   :  { %290 = vmatpush2.msra.mxu1 %v207_v60 }
  0x5e   :  { %291 = vmatprep.subr.mxu1 %v206_v61 }
  0x5f   :  { %292 = vmatpush2.msra.mxu1 %v205_v62 }
  0x60   :  { %293 = vmatprep.subr.mxu1 %v204_v63 }
  0x61   :  { %294 = vmatpush2.msra.mxu1 %v203_v0 }
  0x62   :  { %295 = vmatprep.subr.mxu1 %v202_v1 }
  0x63   :  { %296 = vmatpush2.msra.mxu1 %v201_v2 }
  0x64   :  { %297 = vmatprep.subr.mxu1 %v200_v3 }
  0x65   :  { %298 = vmatpush2.msra.mxu1 %v199_v4 }
  0x66   :  { %299 = vmatprep.subr.mxu1 %v198_v5 }
  0x67   :  { %300 = vmatpush2.msra.mxu1 %v197_v6 }
  0x68   :  { %301 = vmatprep.subr.mxu1 %v196_v7 }
  0x69   :  { %302 = vmatpush2.msra.mxu1 %v195_v8 }
  0xee   :  { %v156_v16 = vpop.f32.mrf.mxu0 }
  0xef   :  { %v157_v17 = vadd.f32 %v156_v16, %v79_v14 }
  0xf0   :  { %v158_v18 = vpop.f32.mrf.mxu0 }
  0xf1   :  { %v159_v19 = vadd.f32 %v158_v18, %v83_v15  ;;  %v161_v21 = vmax.f32 %v157_v17, 0.0 }
  0xf3   :  { %v162_v20 = vmax.f32 %v159_v19, 0.0 }
  0xf5   :  { %303 = vmatprep.mubr.f32.mxu1 %v162_v20 }
  0xf6   :  { %304 = vmatmul.mubr.f32.vlgmr.msra.gmra.mxu1 %v161_v21 }
 0x1b6   :  { %v305_v25 = vpop.f32.mrf.mxu1 }
 0x1b7   :  { %v306_v27 = vadd.f32 %v305_v25, %v232_v23 }
 0x1b8   :  { %v307_v28 = vpop.f32.mrf.mxu1 }
 0x1b9   :  { %v310_v29 = vmax.f32 %v306_v27, 0.0  ;;  %v308_v30 = vadd.f32 %v307_v28, %v236_v24 }
 0x1bb   :  { %v311_v33 = vmax.f32 %v308_v30, 0.0  ;;  %v324_v34 = vmul.f32 %v317_v31, %v310_v29 }
 0x1bd   :  { %v325_v35 = vmul.f32 %v321_v32, %v311_v33 }
 0x1bf   :  { %v326_v36 = vadd.f32 %v325_v35, %v324_v34 }
 0x1c1   :  { %327 = vadd.xlane.f32.xlu0 %v326_v36 }
 0x24a   :  { %v328_v38 = vpop.xlane.xlu0 %327 }
 0x24b   :  { %v336_v39 = vadd.f32 %v346_v37, %v328_v38 }
 0x24d   :  { %338 = vst.msk [vmem:[%s494_s7] sm:$0xff] %vm337_vm1, %v336_v39 }
 0x24e   :  { %343 = vsyncpa [#allocation4], 1 }
 0x24f   :  { %344 = vsyncpa [#allocation6], 1 }

// kernel: tpu_custom_call.1
= control target key start
LH: loop header
LB: loop body
LE: loop exit
PB: predicated region body
PF: predicated region fallthrough
CT: control target
= control target key end

     0   :  { %s487_s0 = inlined_call_operand.hbm [shape: f32[8,24], index: 0, kind: input, shape index: {}]   ;;  %s488_s1 = inlined_call_operand.hbm [shape: f32[24,256], index: 1, kind: input, shape index: {}]   ;;  %s489_s2 = inlined_call_operand.vmem [shape: f32[1,256], index: 2, kind: input, shape index: {}]   ;;  %s490_s3 = inlined_call_operand.hbm [shape: f32[256,256], index: 3, kind: input, shape index: {}]   ;;  %s491_s4 = inlined_call_operand.vmem [shape: f32[1,256], index: 4, kind: input, shape index: {}]   ;;  %s492_s5 = inlined_call_operand.vmem [shape: f32[1,256], index: 5, kind: input, shape index: {}]   ;;  %s493_s6 = inlined_call_operand.<no memory space> [shape: f32[1,1], index: 6, kind: input, shape index: {}]   ;;  %s494_s7 = inlined_call_operand.vmem [shape: f32[8,1], index: 7, kind: output, shape index: {}]  }
   0x1   :  { %v12_v0 = vstv %s493_s6 }
   0x2   :  { %13 = vst [vmem:[#allocation2] sm:$0x1] %v12_v0 }
   0x3   :  { %14 = vsyncpa [#allocation4], 0 }
   0x4   :  { %15 = vsyncpa [#allocation6], 0  ;;  %s417_s26 = smov [#allocation5]  }
   0x5   :  { %s31_s27 = sshll.u32 %s417_s26, 4  ;;  %s32_s27 = int_to_ptr.vmem [resolvable:$true] %s31_s27 }
   0x6   :  { %s361_s28 = scalar_lea.vmem %s32_s27, 768  ;;  %p366_p1 = scmp.lt.s32.totalorder %s32_s27, %s32_s27 }
   0x7   :  { %p362_p0 = scmp.ne.s32.totalorder %s32_s27, %s361_s28  ;;  %p367_p2 = scmp.lt.s32.totalorder %s361_s28, %s361_s28 }
   0x9   :  { %p368_p3 = por %p367_p2, %p366_p1 }
   0xb   :  { %p369_p4 = pnand %p368_p3, %p362_p0 }
   0xd   :  { %372 = shalt.err (!%p369_p4)
}
   0xe   :  { %s418_s29 = smov 256   ;;  %s419_s30 = smov 16  }
   0xf   :  { %37 = dma.hbm_to_vmem [thread:$0]  %s488_s1, 768, %s32_s27, [#allocation6], %s418_s29, %s418_s29, %s419_s30  }
  0x10   :  { %s420_s6 = smov [#allocation3]   ;;  %s421_s11 = smov [#allocation7]  }
  0x11   :  { %s22_s10 = sshll.u32 %s420_s6, 4  ;;  %s45_s12 = sshll.u32 %s421_s11, 4  ;;  %s23_s10 = int_to_ptr.vmem [resolvable:$true] %s22_s10  ;;  %s46_s12 = int_to_ptr.vmem [resolvable:$true] %s45_s12 }
  0x12   :  { %s381_s13 = scalar_lea.vmem %s23_s10, 128  ;;  %p386_p6 = scmp.lt.s32.totalorder %s23_s10, %s23_s10 }
  0x13   :  { %p382_p5 = scmp.ne.s32.totalorder %s23_s10, %s381_s13  ;;  %p387_p7 = scmp.lt.s32.totalorder %s381_s13, %s381_s13 }
  0x15   :  { %p388_p8 = por %p387_p7, %p386_p6 }
  0x17   :  { %p389_p9 = pnand %p388_p8, %p382_p5 }
  0x19   :  { %392 = shalt.err (!%p389_p9)
}
  0x1a   :  { %25 = dma.hbm_to_vmem [thread:$0]  %s487_s0, 128, %s23_s10, [#allocation4]  }
  0x1b   :  { %s401_s16 = scalar_lea.vmem %s46_s12, 8192  ;;  %p406_p11 = scmp.lt.s32.totalorder %s46_s12, %s46_s12 }
  0x1c   :  { %p402_p10 = scmp.ne.s32.totalorder %s46_s12, %s401_s16  ;;  %p407_p12 = scmp.lt.s32.totalorder %s401_s16, %s401_s16 }
  0x1e   :  { %p408_p13 = por %p407_p12, %p406_p11 }
  0x20   :  { %p409_p0 = pnand %p408_p13, %p402_p10 }
  0x22   :  { %412 = shalt.err (!%p409_p0)
}
  0x23   :  { %51 = dma.hbm_to_vmem [thread:$0]  %s490_s3, 8192, %s46_s12, [#allocation6], %s418_s29, %s418_s29, %s419_s30  }
  0x24   :  { %413 = dma.done.wait [#allocation4], 128  }
  0x25   :  { %414 = vsyncadd [#allocation4], 4294967168 }
  0x26   :  { %415 = dma.done.wait [#allocation6], 8960  }
  0x27   :  { %416 = vsyncadd [#allocation6], 4294958336  ;;  %v422_v1 = vmov 0.0   ;;  %v73_v2 = vld [vmem:[#allocation5 + $0x28] sm:$0xff]  ;;  %v72_v3 = vld [vmem:[#allocation5 + $0x20] sm:$0xff]  ;;  %vm86_vm0 = vcmask 195584  }
  0x28   :  { %154 = vmatprep.mubr.f32.mxu0 %v422_v1  ;;  %v71_v4 = vld [vmem:[#allocation5 + $0x18] sm:$0xff]  ;;  %116 = vmatprep.subr.mxu0 %v73_v2  ;;  %v70_v5 = vld [vmem:[#allocation5 + $0x10] sm:$0xff]  ;;  %v69_v6 = vld [vmem:[#allocation5 + $0x8] sm:$0xff]  ;;  %vm337_vm1 = vcmask 7168  }
  0x29   :  { %117 = vmatpush1.msra.mxu0 %v72_v3  ;;  %v194_v7 = vld [vmem:[#allocation7 + $0xf8] sm:$0xff]  ;;  %v193_v8 = vld [vmem:[#allocation7 + $0xf0] sm:$0xff]  ;;  %v192_v10 = vld [vmem:[#allocation7 + $0xe8] sm:$0xff] }
  0x2a   :  { %118 = vmatprep.subr.mxu0 %v71_v4  ;;  %v68_v9 = vld [vmem:[#allocation5] sm:$0xff]  ;;  %239 = vmatprep.subr.mxu1 %v194_v7  ;;  %v191_v11 = vld [vmem:[#allocation7 + $0xe0] sm:$0xff]  ;;  %v67_v12 = vld [vmem:[#allocation3] sm:$0xff] }
  0x2b   :  { %119 = vmatpush1.msra.mxu0 %v70_v5  ;;  %240 = vmatpush1.msra.mxu1 %v193_v8  ;;  %v190_v13 = vld [vmem:[#allocation7 + $0xd8] sm:$0xff]  ;;  %v189_v14 = vld [vmem:[#allocation7 + $0xd0] sm:$0xff]  ;;  %v188_v15 = vld [vmem:[#allocation7 + $0xc8] sm:$0xff] }
  0x2c   :  { %120 = vmatprep.subr.mxu0 %v69_v6  ;;  %241 = vmatprep.subr.mxu1 %v192_v10  ;;  %v187_v16 = vld [vmem:[#allocation7 + $0xc0] sm:$0xff]  ;;  %v186_v17 = vld [vmem:[#allocation7 + $0xb8] sm:$0xff]  ;;  %v185_v18 = vld [vmem:[#allocation7 + $0xb0] sm:$0xff] }
  0x2d   :  { %121 = vmatpush1.msra.mxu0 %v68_v9  ;;  %242 = vmatpush1.msra.mxu1 %v191_v11  ;;  %v184_v19 = vld [vmem:[#allocation7 + $0xa8] sm:$0xff]  ;;  %v183_v20 = vld [vmem:[#allocation7 + $0xa0] sm:$0xff]  ;;  %v182_v21 = vld [vmem:[#allocation7 + $0x98] sm:$0xff]  ;;  %v76_v9 = vlaneseq }
  0x2e   :  { %345 = vmatmul.mubr.msk.f32.vlgmr.msra.gmra.mxu0 %vm86_vm0, %v67_v12  ;;  %243 = vmatprep.subr.mxu1 %v190_v13  ;;  %v181_v22 = vld [vmem:[#allocation7 + $0x90] sm:$0xff]  ;;  %v180_v23 = vld [vmem:[#allocation7 + $0x88] sm:$0xff]  ;;  %v179_v24 = vld [vmem:[#allocation7 + $0x80] sm:$0xff] }
  0x2f   :  { %244 = vmatpush1.msra.mxu1 %v189_v14  ;;  %v178_v25 = vld [vmem:[#allocation7 + $0x78] sm:$0xff]  ;;  %v177_v26 = vld [vmem:[#allocation7 + $0x70] sm:$0xff]  ;;  %v176_v27 = vld [vmem:[#allocation7 + $0x68] sm:$0xff]  ;;  %v77_v10 = vshrl.u32 %v76_v9, 7 }
  0x30   :  { %245 = vmatprep.subr.mxu1 %v188_v15  ;;  %v175_v28 = vld [vmem:[#allocation7 + $0x60] sm:$0xff]  ;;  %v174_v29 = vld [vmem:[#allocation7 + $0x58] sm:$0xff]  ;;  %v173_v30 = vld [vmem:[#allocation7 + $0x50] sm:$0xff] }
  0x31   :  { %246 = vmatpush1.msra.mxu1 %v187_v16  ;;  %v172_v31 = vld [vmem:[#allocation7 + $0x48] sm:$0xff]  ;;  %v171_v32 = vld [vmem:[#allocation7 + $0x40] sm:$0xff]  ;;  %v170_v33 = vld [vmem:[#allocation7 + $0x38] sm:$0xff]  ;;  %v78_v11 = vsub.s32 0, %v77_v10  ;;  %v82_v13 = vsub.s32 1, %v77_v10 }
  0x32   :  { %247 = vmatprep.subr.mxu1 %v186_v17  ;;  %v169_v34 = vld [vmem:[#allocation7 + $0x30] sm:$0xff]  ;;  %v168_v35 = vld [vmem:[#allocation7 + $0x28] sm:$0xff]  ;;  %v167_v36 = vld [vmem:[#allocation7 + $0x20] sm:$0xff] }
  0x33   :  { %248 = vmatpush1.msra.mxu1 %v185_v18  ;;  %v166_v37 = vld [vmem:[#allocation7 + $0x18] sm:$0xff]  ;;  %v165_v38 = vld [vmem:[#allocation7 + $0x10] sm:$0xff]  ;;  %v164_v39 = vld [vmem:[#allocation7 + $0x8] sm:$0xff] }
  0x34   :  { %249 = vmatprep.subr.mxu1 %v184_v19  ;;  %v163_v40 = vld [vmem:[#allocation7] sm:$0xff]  ;;  %v226_v41 = vld [vmem:[#allocation7 + $0x1f8] sm:$0xff]  ;;  %v225_v42 = vld [vmem:[#allocation7 + $0x1f0] sm:$0xff] }
  0x35   :  { %250 = vmatpush1.msra.mxu1 %v183_v20  ;;  %v224_v43 = vld [vmem:[#allocation7 + $0x1e8] sm:$0xff]  ;;  %v223_v44 = vld [vmem:[#allocation7 + $0x1e0] sm:$0xff]  ;;  %v222_v45 = vld [vmem:[#allocation7 + $0x1d8] sm:$0xff] }
  0x36   :  { %251 = vmatprep.subr.mxu1 %v182_v21  ;;  %v221_v46 = vld [vmem:[#allocation7 + $0x1d0] sm:$0xff]  ;;  %v220_v47 = vld [vmem:[#allocation7 + $0x1c8] sm:$0xff]  ;;  %v219_v48 = vld [vmem:[#allocation7 + $0x1c0] sm:$0xff] }
  0x37   :  { %252 = vmatpush1.msra.mxu1 %v181_v22  ;;  %v218_v49 = vld [vmem:[#allocation7 + $0x1b8] sm:$0xff]  ;;  %v217_v50 = vld [vmem:[#allocation7 + $0x1b0] sm:$0xff]  ;;  %v216_v51 = vld [vmem:[#allocation7 + $0x1a8] sm:$0xff] }
  0x38   :  { %253 = vmatprep.subr.mxu1 %v180_v23  ;;  %v215_v52 = vld [vmem:[#allocation7 + $0x1a0] sm:$0xff]  ;;  %v214_v53 = vld [vmem:[#allocation7 + $0x198] sm:$0xff]  ;;  %v213_v54 = vld [vmem:[#allocation7 + $0x190] sm:$0xff] }
  0x39   :  { %254 = vmatpush1.msra.mxu1 %v179_v24  ;;  %v212_v55 = vld [vmem:[#allocation7 + $0x188] sm:$0xff]  ;;  %v211_v56 = vld [vmem:[#allocation7 + $0x180] sm:$0xff]  ;;  %v210_v57 = vld [vmem:[#allocation7 + $0x178] sm:$0xff] }
  0x3a   :  { %255 = vmatprep.subr.mxu1 %v178_v25  ;;  %v209_v58 = vld [vmem:[#allocation7 + $0x170] sm:$0xff]  ;;  %v208_v59 = vld [vmem:[#allocation7 + $0x168] sm:$0xff]  ;;  %v207_v60 = vld [vmem:[#allocation7 + $0x160] sm:$0xff] }
  0x3b   :  { %256 = vmatpush1.msra.mxu1 %v177_v26  ;;  %v206_v61 = vld [vmem:[#allocation7 + $0x158] sm:$0xff]  ;;  %v205_v62 = vld [vmem:[#allocation7 + $0x150] sm:$0xff]  ;;  %v204_v63 = vld [vmem:[#allocation7 + $0x148] sm:$0xff] }
  0x3c   :  { %257 = vmatprep.subr.mxu1 %v176_v27  ;;  %v203_v0 = vld [vmem:[#allocation7 + $0x140] sm:$0xff]  ;;  %v202_v1 = vld [vmem:[#allocation7 + $0x138] sm:$0xff]  ;;  %v201_v2 = vld [vmem:[#allocation7 + $0x130] sm:$0xff] }
  0x3d   :  { %258 = vmatpush1.msra.mxu1 %v175_v28  ;;  %v200_v3 = vld [vmem:[#allocation7 + $0x128] sm:$0xff]  ;;  %v199_v4 = vld [vmem:[#allocation7 + $0x120] sm:$0xff]  ;;  %v198_v5 = vld [vmem:[#allocation7 + $0x118] sm:$0xff] }
  0x3e   :  { %259 = vmatprep.subr.mxu1 %v174_v29  ;;  %v197_v6 = vld [vmem:[#allocation7 + $0x110] sm:$0xff]  ;;  %v196_v7 = vld [vmem:[#allocation7 + $0x108] sm:$0xff]  ;;  %v195_v8 = vld [vmem:[#allocation7 + $0x100] sm:$0xff] }
  0x3f   :  { %260 = vmatpush1.msra.mxu1 %v173_v30  ;;  %v74_v12 = vld [vmem:[%s489_s2] sm:$0x3] }
  0x40   :  { %261 = vmatprep.subr.mxu1 %v172_v31  ;;  %v79_v14 = vrot.slane %v74_v12, %v78_v11  ;;  %v83_v15 = vrot.slane %v74_v12, %v82_v13  ;;  %v227_v22 = vld [vmem:[%s491_s4] sm:$0x3] }
  0x41   :  { %262 = vmatpush1.msra.mxu1 %v171_v32  ;;  %v232_v23 = vrot.slane %v227_v22, %v78_v11  ;;  %v236_v24 = vrot.slane %v227_v22, %v82_v13  ;;  %v312_v26 = vld [vmem:[%s492_s5] sm:$0x3] }
  0x42   :  { %263 = vmatprep.subr.mxu1 %v170_v33  ;;  %v317_v31 = vrot.slane %v312_v26, %v78_v11  ;;  %v321_v32 = vrot.slane %v312_v26, %v82_v13 }
  0x43   :  { %264 = vmatpush1.msra.mxu1 %v169_v34 }
  0x44   :  { %265 = vmatprep.subr.mxu1 %v168_v35 }
  0x45   :  { %266 = vmatpush1.msra.mxu1 %v167_v36 }
  0x46   :  { %267 = vmatprep.subr.mxu1 %v166_v37  ;;  %v346_v37 = vld [vmem:[#allocation2] ss:$0 sm:$0xff] }
  0x47   :  { %268 = vmatpush1.msra.mxu1 %v165_v38 }
  0x48   :  { %269 = vmatprep.subr.mxu1 %v164_v39 }
  0x49   :  { %270 = vmatpush1.msra.mxu1 %v163_v40 }
  0x4a   :  { %271 = vmatprep.subr.mxu1 %v226_v41 }
  0x4b   :  { %272 = vmatpush2.msra.mxu1 %v225_v42 }
  0x4c   :  { %273 = vmatprep.subr.mxu1 %v224_v43 }
  0x4d   :  { %274 = vmatpush2.msra.mxu1 %v223_v44 }
  0x4e   :  { %275 = vmatprep.subr.mxu1 %v222_v45 }
  0x4f   :  { %276 = vmatpush2.msra.mxu1 %v221_v46 }
  0x50   :  { %277 = vmatprep.subr.mxu1 %v220_v47 }
  0x51   :  { %278 = vmatpush2.msra.mxu1 %v219_v48 }
  0x52   :  { %279 = vmatprep.subr.mxu1 %v218_v49 }
  0x53   :  { %280 = vmatpush2.msra.mxu1 %v217_v50 }
  0x54   :  { %281 = vmatprep.subr.mxu1 %v216_v51 }
  0x55   :  { %282 = vmatpush2.msra.mxu1 %v215_v52 }
  0x56   :  { %283 = vmatprep.subr.mxu1 %v214_v53 }
  0x57   :  { %284 = vmatpush2.msra.mxu1 %v213_v54 }
  0x58   :  { %285 = vmatprep.subr.mxu1 %v212_v55 }
  0x59   :  { %286 = vmatpush2.msra.mxu1 %v211_v56 }
  0x5a   :  { %287 = vmatprep.subr.mxu1 %v210_v57 }
  0x5b   :  { %288 = vmatpush2.msra.mxu1 %v209_v58 }
  0x5c   :  { %289 = vmatprep.subr.mxu1 %v208_v59 }
  0x5d   :  { %290 = vmatpush2.msra.mxu1 %v207_v60 }
  0x5e   :  { %291 = vmatprep.subr.mxu1 %v206_v61 }
  0x5f   :  { %292 = vmatpush2.msra.mxu1 %v205_v62 }
  0x60   :  { %293 = vmatprep.subr.mxu1 %v204_v63 }
  0x61   :  { %294 = vmatpush2.msra.mxu1 %v203_v0 }
  0x62   :  { %295 = vmatprep.subr.mxu1 %v202_v1 }
  0x63   :  { %296 = vmatpush2.msra.mxu1 %v201_v2 }
  0x64   :  { %297 = vmatprep.subr.mxu1 %v200_v3 }
  0x65   :  { %298 = vmatpush2.msra.mxu1 %v199_v4 }
  0x66   :  { %299 = vmatprep.subr.mxu1 %v198_v5 }
  0x67   :  { %300 = vmatpush2.msra.mxu1 %v197_v6 }
  0x68   :  { %301 = vmatprep.subr.mxu1 %v196_v7 }
  0x69   :  { %302 = vmatpush2.msra.mxu1 %v195_v8 }
  0xee   :  { %v156_v16 = vpop.f32.mrf.mxu0 }
  0xef   :  { %v157_v17 = vadd.f32 %v156_v16, %v79_v14 }
  0xf0   :  { %v158_v18 = vpop.f32.mrf.mxu0 }
  0xf1   :  { %v159_v19 = vadd.f32 %v158_v18, %v83_v15  ;;  %v161_v21 = vmax.f32 %v157_v17, 0.0 }
  0xf3   :  { %v162_v20 = vmax.f32 %v159_v19, 0.0 }
  0xf5   :  { %303 = vmatprep.mubr.f32.mxu1 %v162_v20 }
  0xf6   :  { %304 = vmatmul.mubr.f32.vlgmr.msra.gmra.mxu1 %v161_v21 }
 0x1b6   :  { %v305_v25 = vpop.f32.mrf.mxu1 }
 0x1b7   :  { %v306_v27 = vadd.f32 %v305_v25, %v232_v23 }
 0x1b8   :  { %v307_v28 = vpop.f32.mrf.mxu1 }
 0x1b9   :  { %v310_v29 = vmax.f32 %v306_v27, 0.0  ;;  %v308_v30 = vadd.f32 %v307_v28, %v236_v24 }
 0x1bb   :  { %v311_v33 = vmax.f32 %v308_v30, 0.0  ;;  %v324_v34 = vmul.f32 %v317_v31, %v310_v29 }
 0x1bd   :  { %v325_v35 = vmul.f32 %v321_v32, %v311_v33 }
 0x1bf   :  { %v326_v36 = vadd.f32 %v325_v35, %v324_v34 }
 0x1c1   :  { %327 = vadd.xlane.f32.xlu0 %v326_v36 }
 0x24a   :  { %v328_v38 = vpop.xlane.xlu0 %327 }
 0x24b   :  { %v336_v39 = vadd.f32 %v346_v37, %v328_v38 }
 0x24d   :  { %338 = vst.msk [vmem:[%s494_s7] sm:$0xff] %vm337_vm1, %v336_v39 }
 0x24e   :  { %343 = vsyncpa [#allocation4], 1 }
 0x24f   :  { %344 = vsyncpa [#allocation6], 1 }

</bundles_post_ra>
